<compile_context>
chip_gen: v7x
topology: tpu7x:2x2x1
jax: 0.10.0
libtpu: 0.0.40
codegen_flags: <defaults>
</compile_context>

<pallas_src>
import functools
import math

import jax
import jax.numpy as jnp
from jax import lax
from jax.experimental import pallas as pl
from jax.experimental.pallas import tpu as pltpu

_MASK_VALUE = -1.0e30   # finite "minus infinity": exp(_MASK_VALUE - m) underflows to 0.0


def _mha_fused_kernel(x_ref, w_ref, o_ref,
                      q_scr, k_scr, v_scr, m_scr, l_scr, acc_scr,
                      *, causal, num_heads, head_size, kv_blk):
    """One grid step = one batch element.  All heads processed as one batched einsum."""
    T = x_ref.shape[1]
    HH = num_heads * head_size
    num_kv = T // kv_blk

    x = x_ref[0]            # (T, E)       bf16
    w = w_ref[...]          # (E, 3*nh*H)  bf16, columns ordered [Q heads | K heads | V heads]

    # Single fused QKV projection on the MXU, f32 accumulation.
    qkv = jnp.dot(x, w, preferred_element_type=jnp.float32)        # (T, 3*nh*H) f32

    # Layout staging only (small copies): per-head columns -> (nh, T, H) scratch so the
    # attention below runs as head-batched einsums and KV blocks can be sliced with pl.ds.
    for h in range(num_heads):
        lo = h * head_size
        q_scr[h] = qkv[:, 0 * HH + lo:0 * HH + lo + head_size].astype(jnp.bfloat16)
        k_scr[h] = qkv[:, 1 * HH + lo:1 * HH + lo + head_size].astype(jnp.bfloat16)
        v_scr[h] = qkv[:, 2 * HH + lo:2 * HH + lo + head_size].astype(jnp.bfloat16)

    q = q_scr[...]                                                  # (nh, T, H) bf16

    # Online-softmax state (f32).
    m_scr[...] = jnp.full_like(m_scr, _MASK_VALUE)
    l_scr[...] = jnp.zeros_like(l_scr)
    acc_scr[...] = jnp.zeros_like(acc_scr)

    if causal:
        row = lax.broadcasted_iota(jnp.int32, (1, T, kv_blk), 1)    # hoisted out of loop
        col = lax.broadcasted_iota(jnp.int32, (1, T, kv_blk), 2)

    @pl.loop(0, num_kv)
    def _(j):
        start = pl.multiple_of(j * kv_blk, kv_blk)
        k_j = k_scr[:, pl.ds(start, kv_blk), :]                     # (nh, kv_blk, H)
        v_j = v_scr[:, pl.ds(start, kv_blk), :]

        # Head-batched scores on the MXU (bf16 operands, f32 accumulation).
        s = jnp.einsum('htd,hkd->htk', q, k_j,
                       preferred_element_type=jnp.float32)          # (nh, T, kv_blk)
        if causal:
            s = jnp.where(col + start <= row, s, _MASK_VALUE)
        # 'decoder' mask_type => all-ones mask => no masking (reproduced exactly).

        # Online softmax update (f32 elementwise).
        m_prev = m_scr[...]
        m_new = jnp.maximum(m_prev, jnp.max(s, axis=-1, keepdims=True))
        alpha = jnp.exp(m_prev - m_new)
        p = jnp.exp(s - m_new)
        l_scr[...] = alpha * l_scr[...] + jnp.sum(p, axis=-1, keepdims=True)
        acc_scr[...] = alpha * acc_scr[...] + jnp.einsum(
            'htk,hkd->htd', p.astype(jnp.bfloat16), v_j,
            preferred_element_type=jnp.float32)                     # (nh, T, H)
        m_scr[...] = m_new

    # Reference order of ops: softmax(scores), THEN divide by sqrt(head_size), THEN @ V.
    # Here: acc = sum(exp * V), so normalize by l and fold in 1/sqrt(H) at the end.
    inv_sqrt_h = 1.0 / math.sqrt(head_size)
    out = acc_scr[...] * (inv_sqrt_h / l_scr[...])                  # (nh, T, H) f32

    # Write the concatenated-heads layout directly (same column order as
    # torch.cat([head(x) for head in heads], dim=-1)).
    for h in range(num_heads):
        lo = h * head_size
        o_ref[0, :, lo:lo + head_size] = out[h].astype(o_ref.dtype)


def _fuse_weights(wq, wk, wv):
    """(nh, H, E) per projection -> single pre-transposed (E, 3*nh*H) matrix.

    Column (proj*nh*H + h*H + j) holds w_proj[h, j, :], so x @ W reproduces the exact
    per-head column order of the PyTorch reference.
    """
    def t(w):
        nh, H, E = w.shape
        return w.reshape(nh * H, E).T                               # (E, nh*H)

    return jnp.concatenate([t(wq), t(wk), t(wv)], axis=1)


def _pick_kv_block(T):
    """Largest lane-friendly KV block that divides T; falls back to the full T."""
    for blk in (512, 256, 128):
        if T % blk == 0:
            return blk
    return T


def multi_headed_attention(x, wq, wk, wv, mask_type="encoder"):
    """x: (B, T, E); wq/wk/wv: (num_heads, head_size, E). Returns (B, T, num_heads*head_size)."""
    assert mask_type in ("encoder", "decoder")
    B, T, E = x.shape
    nh, H, E2 = wq.shape
    assert E2 == E and wk.shape == wq.shape and wv.shape == wq.shape
    HH = nh * H
    kv_blk = _pick_kv_block(T)

    # bf16 operands for every matmul (MXU-native); also halves HBM->VMEM DMA bytes.
    x_bf16 = x.astype(jnp.bfloat16)
    w_fused = _fuse_weights(wq, wk, wv).astype(jnp.bfloat16)        # (E, 3*nh*H)

    kernel = functools.partial(
        _mha_fused_kernel,
        causal=(mask_type == "encoder"),
        num_heads=nh,
        head_size=H,
        kv_blk=kv_blk,
    )

    # Explicit VMEM budget sized from the actual blocks (x2 headroom), clamped well under
    # the smallest physical VMEM across generations (64 MiB on v7x).
    f32b, bf16b = 4, 2
    est_vmem = (
        2 * T * E * bf16b                      # x block, double-buffered
        + 2 * E * 3 * HH * bf16b               # fused weights, double-buffered
        + 2 * T * HH * x.dtype.itemsize        # output block, double-buffered
        + T * 3 * HH * f32b                    # qkv projection result
        + 3 * nh * T * H * bf16b               # q/k/v scratch
        + nh * T * (H + 2) * f32b              # online-softmax state (acc, m, l)
        + 2 * nh * T * kv_blk * f32b           # scores + exp(scores) working set
    )
    vmem_limit = int(min(max(2 * est_vmem, 8 << 20), 56 << 20))

    # One grid step per batch element.  With B >= 2 this feeds both v7x TensorCores
    # ("parallel"); on single-TC v5e/v6e it is a short serial loop (~0.35 us/step).
    out = pl.pallas_call(
        kernel,
        out_shape=jax.ShapeDtypeStruct((B, T, HH), x.dtype),
        grid=(B,),
        in_specs=[
            pl.BlockSpec((1, T, E), lambda b: (b, 0, 0)),           # x tile for batch b
            pl.BlockSpec((E, 3 * HH), lambda b: (0, 0)),            # fused weights (constant)
        ],
        out_specs=pl.BlockSpec((1, T, HH), lambda b: (b, 0, 0)),
        scratch_shapes=[
            pltpu.VMEM((nh, T, H), jnp.bfloat16),                   # Q (head-batched)
            pltpu.VMEM((nh, T, H), jnp.bfloat16),                   # K
            pltpu.VMEM((nh, T, H), jnp.bfloat16),                   # V
            pltpu.VMEM((nh, T, 1), jnp.float32),                    # running max m
            pltpu.VMEM((nh, T, 1), jnp.float32),                    # running denom l
            pltpu.VMEM((nh, T, H), jnp.float32),                    # output accumulator
        ],
        compiler_params=pltpu.CompilerParams(
            dimension_semantics=("parallel",),
            vmem_limit_bytes=vmem_limit,
        ),
    )(x_bf16, w_fused)

    return out


def _reference(x, wq, wk, wv, mask_type, head_size, matmul_dtype=jnp.float32):
    """Pure-JAX replica of the PyTorch forward.  matmul_dtype=bfloat16 gives a
    matched-precision reference (bf16 operands, f32 accumulation) for tight checks."""
    def mm(a, b):
        return jnp.matmul(a.astype(matmul_dtype), b.astype(matmul_dtype),
                          preferred_element_type=jnp.float32)

    T = x.shape[1]
    outs = []
    for h in range(wq.shape[0]):
        q = mm(x, wq[h].T)
        k = mm(x, wk[h].T)
        v = mm(x, wv[h].T)
        match = mm(q, jnp.swapaxes(k, -2, -1))
        if mask_type == "encoder":
            mask = jnp.tril(jnp.ones((T, T)))
            match = jnp.where(mask == 0, -jnp.inf, match)
        attn = jax.nn.softmax(match, axis=-1) / math.sqrt(head_size)
        outs.append(mm(attn, v))
    return jnp.concatenate(outs, axis=-1)


if __name__ == "__main__":
    # Module hyperparameters (small, consistent with the forward pass).
    B = 2
    context_window_len = 8           # T must equal context_window_len for the mask
    emb_dim = 32
    num_heads = 4
    head_size = emb_dim // num_heads

    key = jax.random.PRNGKey(0)
    kx, kq, kk, kv = jax.random.split(key, 4)

    x = jax.random.normal(kx, (B, context_window_len, emb_dim), dtype=jnp.float32)
    # Deterministic nn.Linear-style init: uniform(-1/sqrt(E), 1/sqrt(E)), no bias.
    bound = 1.0 / math.sqrt(emb_dim)
    wq = jax.random.uniform(kq, (num_heads, head_size, emb_dim), jnp.float32, -bound, bound)
    wk = jax.random.uniform(kk, (num_heads, head_size, emb_dim), jnp.float32, -bound, bound)
    wv = jax.random.uniform(kv, (num_heads, head_size, emb_dim), jnp.float32, -bound, bound)

    ok = True
    for mask_type in ("encoder", "decoder"):
        out = jax.block_until_ready(multi_headed_attention(x, wq, wk, wv, mask_type))
        assert out.shape == (B, context_window_len, emb_dim), out.shape

        # Tight check vs a matched-precision (bf16-operand) reference: isolates structural
        # correctness from the intentional bf16 MXU rounding.
        ref_bf16 = _reference(x, wq, wk, wv, mask_type, head_size, matmul_dtype=jnp.bfloat16)
        if not jnp.allclose(out, ref_bf16, atol=1e-2, rtol=1e-2):
            ok = False
        # Loose check vs the pure-f32 reference: tolerance is the bf16-operand error budget.
        ref_f32 = _reference(x, wq, wk, wv, mask_type, head_size)
        if not jnp.allclose(out, ref_f32, atol=3e-2, rtol=3e-2):
            ok = False

    assert ok, "mismatch vs reference"
    print("KERNEL_OK")
</pallas_src>

<mosaic_0001>
module attributes {stable_mosaic.version = 11 : i64} {
  func.func @_mha_fused_kernel(%arg0: i32, %arg1: memref<1x8x32xbf16, #tpu.memory_space<vmem>>, %arg2: memref<32x96xbf16, #tpu.memory_space<vmem>>, %arg3: memref<1x8x32xf32, #tpu.memory_space<vmem>>, %arg4: memref<4x8x8xbf16, #tpu.memory_space<vmem>>, %arg5: memref<4x8x8xbf16, #tpu.memory_space<vmem>>, %arg6: memref<4x8x8xbf16, #tpu.memory_space<vmem>>, %arg7: memref<4x8x1xf32, #tpu.memory_space<vmem>>, %arg8: memref<4x8x1xf32, #tpu.memory_space<vmem>>, %arg9: memref<4x8x8xf32, #tpu.memory_space<vmem>>) attributes {dimension_semantics = [#tpu.dimension_semantics<parallel>], iteration_bounds = array<i64: 2>, scalar_prefetch = 0 : i64, scratch_operands = 6 : i64, tpu.core_type = #tpu.core_type<tc>, window_params = [{transform_indices = @transform_0, window_bounds = array<i64: 1, 8, 32>}, {pipeline_mode = #tpu.pipeline_mode<synchronous>, transform_indices = @transform_1, window_bounds = array<i64: 32, 96>}, {transform_indices = @transform_2, window_bounds = array<i64: 1, 8, 32>}]} {
    %c0 = arith.constant 0 : index
    %c0_0 = arith.constant 0 : index
    %c0_1 = arith.constant 0 : index
    %0 = vector.load %arg1[%c0, %c0_0, %c0_1] : memref<1x8x32xbf16, #tpu.memory_space<vmem>>, vector<1x8x32xbf16>
    %1 = vector.shape_cast %0 : vector<1x8x32xbf16> to vector<8x32xbf16>
    %c0_2 = arith.constant 0 : index
    %c0_3 = arith.constant 0 : index
    %2 = vector.load %arg2[%c0_2, %c0_3] : memref<32x96xbf16, #tpu.memory_space<vmem>>, vector<32x96xbf16>
    %cst = arith.constant dense<0.000000e+00> : vector<8x96xf32>
    %3 = tpu.matmul %1, %2, %cst {dimension_numbers = #tpu.dot_dimension_numbers<[1], [0], [0], [1], [0, 0, 1, 1], [], []>} : vector<8x32xbf16>, vector<32x96xbf16>, vector<8x96xf32> -> vector<8x96xf32>
    %4 = vector.extract_strided_slice %3 {offsets = [0, 0], sizes = [8, 8], strides = [1, 1]} : vector<8x96xf32> to vector<8x8xf32>
    %5 = arith.truncf %4 : vector<8x8xf32> to vector<8x8xbf16>
    %c0_4 = arith.constant 0 : index
    %c0_5 = arith.constant 0 : index
    %c0_6 = arith.constant 0 : index
    %6 = vector.load %arg4[%c0_4, %c0_5, %c0_6] : memref<4x8x8xbf16, #tpu.memory_space<vmem>>, vector<1x8x8xbf16>
    %7 = vector.shape_cast %6 : vector<1x8x8xbf16> to vector<8x8xbf16>
    %8 = vector.shape_cast %5 : vector<8x8xbf16> to vector<1x8x8xbf16>
    tpu.vector_store %arg4[%c0_4, %c0_5, %c0_6], %8 {strides = array<i32>} : memref<4x8x8xbf16, #tpu.memory_space<vmem>>, vector<1x8x8xbf16>,
    %9 = vector.extract_strided_slice %3 {offsets = [0, 32], sizes = [8, 8], strides = [1, 1]} : vector<8x96xf32> to vector<8x8xf32>
    %10 = arith.truncf %9 : vector<8x8xf32> to vector<8x8xbf16>
    %c0_7 = arith.constant 0 : index
    %c0_8 = arith.constant 0 : index
    %c0_9 = arith.constant 0 : index
    %11 = vector.load %arg5[%c0_7, %c0_8, %c0_9] : memref<4x8x8xbf16, #tpu.memory_space<vmem>>, vector<1x8x8xbf16>
    %12 = vector.shape_cast %11 : vector<1x8x8xbf16> to vector<8x8xbf16>
    %13 = vector.shape_cast %10 : vector<8x8xbf16> to vector<1x8x8xbf16>
    tpu.vector_store %arg5[%c0_7, %c0_8, %c0_9], %13 {strides = array<i32>} : memref<4x8x8xbf16, #tpu.memory_space<vmem>>, vector<1x8x8xbf16>,
    %14 = vector.extract_strided_slice %3 {offsets = [0, 64], sizes = [8, 8], strides = [1, 1]} : vector<8x96xf32> to vector<8x8xf32>
    %15 = arith.truncf %14 : vector<8x8xf32> to vector<8x8xbf16>
    %c0_10 = arith.constant 0 : index
    %c0_11 = arith.constant 0 : index
    %c0_12 = arith.constant 0 : index
    %16 = vector.load %arg6[%c0_10, %c0_11, %c0_12] : memref<4x8x8xbf16, #tpu.memory_space<vmem>>, vector<1x8x8xbf16>
    %17 = vector.shape_cast %16 : vector<1x8x8xbf16> to vector<8x8xbf16>
    %18 = vector.shape_cast %15 : vector<8x8xbf16> to vector<1x8x8xbf16>
    tpu.vector_store %arg6[%c0_10, %c0_11, %c0_12], %18 {strides = array<i32>} : memref<4x8x8xbf16, #tpu.memory_space<vmem>>, vector<1x8x8xbf16>,
    %19 = vector.extract_strided_slice %3 {offsets = [0, 8], sizes = [8, 8], strides = [1, 1]} : vector<8x96xf32> to vector<8x8xf32>
    %20 = arith.truncf %19 : vector<8x8xf32> to vector<8x8xbf16>
    %c1 = arith.constant 1 : index
    %c0_13 = arith.constant 0 : index
    %c0_14 = arith.constant 0 : index
    %21 = vector.load %arg4[%c1, %c0_13, %c0_14] : memref<4x8x8xbf16, #tpu.memory_space<vmem>>, vector<1x8x8xbf16>
    %22 = vector.shape_cast %21 : vector<1x8x8xbf16> to vector<8x8xbf16>
    %23 = vector.shape_cast %20 : vector<8x8xbf16> to vector<1x8x8xbf16>
    tpu.vector_store %arg4[%c1, %c0_13, %c0_14], %23 {strides = array<i32>} : memref<4x8x8xbf16, #tpu.memory_space<vmem>>, vector<1x8x8xbf16>,
    %24 = vector.extract_strided_slice %3 {offsets = [0, 40], sizes = [8, 8], strides = [1, 1]} : vector<8x96xf32> to vector<8x8xf32>
    %25 = arith.truncf %24 : vector<8x8xf32> to vector<8x8xbf16>
    %c1_15 = arith.constant 1 : index
    %c0_16 = arith.constant 0 : index
    %c0_17 = arith.constant 0 : index
    %26 = vector.load %arg5[%c1_15, %c0_16, %c0_17] : memref<4x8x8xbf16, #tpu.memory_space<vmem>>, vector<1x8x8xbf16>
    %27 = vector.shape_cast %26 : vector<1x8x8xbf16> to vector<8x8xbf16>
    %28 = vector.shape_cast %25 : vector<8x8xbf16> to vector<1x8x8xbf16>
    tpu.vector_store %arg5[%c1_15, %c0_16, %c0_17], %28 {strides = array<i32>} : memref<4x8x8xbf16, #tpu.memory_space<vmem>>, vector<1x8x8xbf16>,
    %29 = vector.extract_strided_slice %3 {offsets = [0, 72], sizes = [8, 8], strides = [1, 1]} : vector<8x96xf32> to vector<8x8xf32>
    %30 = arith.truncf %29 : vector<8x8xf32> to vector<8x8xbf16>
    %c1_18 = arith.constant 1 : index
    %c0_19 = arith.constant 0 : index
    %c0_20 = arith.constant 0 : index
    %31 = vector.load %arg6[%c1_18, %c0_19, %c0_20] : memref<4x8x8xbf16, #tpu.memory_space<vmem>>, vector<1x8x8xbf16>
    %32 = vector.shape_cast %31 : vector<1x8x8xbf16> to vector<8x8xbf16>
    %33 = vector.shape_cast %30 : vector<8x8xbf16> to vector<1x8x8xbf16>
    tpu.vector_store %arg6[%c1_18, %c0_19, %c0_20], %33 {strides = array<i32>} : memref<4x8x8xbf16, #tpu.memory_space<vmem>>, vector<1x8x8xbf16>,
    %34 = vector.extract_strided_slice %3 {offsets = [0, 16], sizes = [8, 8], strides = [1, 1]} : vector<8x96xf32> to vector<8x8xf32>
    %35 = arith.truncf %34 : vector<8x8xf32> to vector<8x8xbf16>
    %c2 = arith.constant 2 : index
    %c0_21 = arith.constant 0 : index
    %c0_22 = arith.constant 0 : index
    %36 = vector.load %arg4[%c2, %c0_21, %c0_22] : memref<4x8x8xbf16, #tpu.memory_space<vmem>>, vector<1x8x8xbf16>
    %37 = vector.shape_cast %36 : vector<1x8x8xbf16> to vector<8x8xbf16>
    %38 = vector.shape_cast %35 : vector<8x8xbf16> to vector<1x8x8xbf16>
    tpu.vector_store %arg4[%c2, %c0_21, %c0_22], %38 {strides = array<i32>} : memref<4x8x8xbf16, #tpu.memory_space<vmem>>, vector<1x8x8xbf16>,
    %39 = vector.extract_strided_slice %3 {offsets = [0, 48], sizes = [8, 8], strides = [1, 1]} : vector<8x96xf32> to vector<8x8xf32>
    %40 = arith.truncf %39 : vector<8x8xf32> to vector<8x8xbf16>
    %c2_23 = arith.constant 2 : index
    %c0_24 = arith.constant 0 : index
    %c0_25 = arith.constant 0 : index
    %41 = vector.load %arg5[%c2_23, %c0_24, %c0_25] : memref<4x8x8xbf16, #tpu.memory_space<vmem>>, vector<1x8x8xbf16>
    %42 = vector.shape_cast %41 : vector<1x8x8xbf16> to vector<8x8xbf16>
    %43 = vector.shape_cast %40 : vector<8x8xbf16> to vector<1x8x8xbf16>
    tpu.vector_store %arg5[%c2_23, %c0_24, %c0_25], %43 {strides = array<i32>} : memref<4x8x8xbf16, #tpu.memory_space<vmem>>, vector<1x8x8xbf16>,
    %44 = vector.extract_strided_slice %3 {offsets = [0, 80], sizes = [8, 8], strides = [1, 1]} : vector<8x96xf32> to vector<8x8xf32>
    %45 = arith.truncf %44 : vector<8x8xf32> to vector<8x8xbf16>
    %c2_26 = arith.constant 2 : index
    %c0_27 = arith.constant 0 : index
    %c0_28 = arith.constant 0 : index
    %46 = vector.load %arg6[%c2_26, %c0_27, %c0_28] : memref<4x8x8xbf16, #tpu.memory_space<vmem>>, vector<1x8x8xbf16>
    %47 = vector.shape_cast %46 : vector<1x8x8xbf16> to vector<8x8xbf16>
    %48 = vector.shape_cast %45 : vector<8x8xbf16> to vector<1x8x8xbf16>
    tpu.vector_store %arg6[%c2_26, %c0_27, %c0_28], %48 {strides = array<i32>} : memref<4x8x8xbf16, #tpu.memory_space<vmem>>, vector<1x8x8xbf16>,
    %49 = vector.extract_strided_slice %3 {offsets = [0, 24], sizes = [8, 8], strides = [1, 1]} : vector<8x96xf32> to vector<8x8xf32>
    %50 = arith.truncf %49 : vector<8x8xf32> to vector<8x8xbf16>
    %c3 = arith.constant 3 : index
    %c0_29 = arith.constant 0 : index
    %c0_30 = arith.constant 0 : index
    %51 = vector.load %arg4[%c3, %c0_29, %c0_30] : memref<4x8x8xbf16, #tpu.memory_space<vmem>>, vector<1x8x8xbf16>
    %52 = vector.shape_cast %51 : vector<1x8x8xbf16> to vector<8x8xbf16>
    %53 = vector.shape_cast %50 : vector<8x8xbf16> to vector<1x8x8xbf16>
    tpu.vector_store %arg4[%c3, %c0_29, %c0_30], %53 {strides = array<i32>} : memref<4x8x8xbf16, #tpu.memory_space<vmem>>, vector<1x8x8xbf16>,
    %54 = vector.extract_strided_slice %3 {offsets = [0, 56], sizes = [8, 8], strides = [1, 1]} : vector<8x96xf32> to vector<8x8xf32>
    %55 = arith.truncf %54 : vector<8x8xf32> to vector<8x8xbf16>
    %c3_31 = arith.constant 3 : index
    %c0_32 = arith.constant 0 : index
    %c0_33 = arith.constant 0 : index
    %56 = vector.load %arg5[%c3_31, %c0_32, %c0_33] : memref<4x8x8xbf16, #tpu.memory_space<vmem>>, vector<1x8x8xbf16>
    %57 = vector.shape_cast %56 : vector<1x8x8xbf16> to vector<8x8xbf16>
    %58 = vector.shape_cast %55 : vector<8x8xbf16> to vector<1x8x8xbf16>
    tpu.vector_store %arg5[%c3_31, %c0_32, %c0_33], %58 {strides = array<i32>} : memref<4x8x8xbf16, #tpu.memory_space<vmem>>, vector<1x8x8xbf16>,
    %59 = vector.extract_strided_slice %3 {offsets = [0, 88], sizes = [8, 8], strides = [1, 1]} : vector<8x96xf32> to vector<8x8xf32>
    %60 = arith.truncf %59 : vector<8x8xf32> to vector<8x8xbf16>
    %c3_34 = arith.constant 3 : index
    %c0_35 = arith.constant 0 : index
    %c0_36 = arith.constant 0 : index
    %61 = vector.load %arg6[%c3_34, %c0_35, %c0_36] : memref<4x8x8xbf16, #tpu.memory_space<vmem>>, vector<1x8x8xbf16>
    %62 = vector.shape_cast %61 : vector<1x8x8xbf16> to vector<8x8xbf16>
    %63 = vector.shape_cast %60 : vector<8x8xbf16> to vector<1x8x8xbf16>
    tpu.vector_store %arg6[%c3_34, %c0_35, %c0_36], %63 {strides = array<i32>} : memref<4x8x8xbf16, #tpu.memory_space<vmem>>, vector<1x8x8xbf16>,
    %c0_37 = arith.constant 0 : index
    %c0_38 = arith.constant 0 : index
    %c0_39 = arith.constant 0 : index
    %64 = vector.load %arg4[%c0_37, %c0_38, %c0_39] : memref<4x8x8xbf16, #tpu.memory_space<vmem>>, vector<4x8x8xbf16>
    %cst_40 = arith.constant -1.000000e+30 : f32
    %65 = vector.broadcast %cst_40 : f32 to vector<4x8x1xf32>
    %c0_41 = arith.constant 0 : index
    %c0_42 = arith.constant 0 : index
    %c0_43 = arith.constant 0 : index
    %66 = vector.load %arg7[%c0_41, %c0_42, %c0_43] : memref<4x8x1xf32, #tpu.memory_space<vmem>>, vector<4x8x1xf32>
    tpu.vector_store %arg7[%c0_41, %c0_42, %c0_43], %65 {strides = array<i32>} : memref<4x8x1xf32, #tpu.memory_space<vmem>>, vector<4x8x1xf32>,
    %cst_44 = arith.constant 0.000000e+00 : f32
    %67 = vector.broadcast %cst_44 : f32 to vector<4x8x1xf32>
    %c0_45 = arith.constant 0 : index
    %c0_46 = arith.constant 0 : index
    %c0_47 = arith.constant 0 : index
    %68 = vector.load %arg8[%c0_45, %c0_46, %c0_47] : memref<4x8x1xf32, #tpu.memory_space<vmem>>, vector<4x8x1xf32>
    tpu.vector_store %arg8[%c0_45, %c0_46, %c0_47], %67 {strides = array<i32>} : memref<4x8x1xf32, #tpu.memory_space<vmem>>, vector<4x8x1xf32>,
    %cst_48 = arith.constant 0.000000e+00 : f32
    %69 = vector.broadcast %cst_48 : f32 to vector<4x8x8xf32>
    %c0_49 = arith.constant 0 : index
    %c0_50 = arith.constant 0 : index
    %c0_51 = arith.constant 0 : index
    %70 = vector.load %arg9[%c0_49, %c0_50, %c0_51] : memref<4x8x8xf32, #tpu.memory_space<vmem>>, vector<4x8x8xf32>
    tpu.vector_store %arg9[%c0_49, %c0_50, %c0_51], %69 {strides = array<i32>} : memref<4x8x8xf32, #tpu.memory_space<vmem>>, vector<4x8x8xf32>,
    %71 = tpu.iota {dimensions = array<i32: 1>} : vector<1x8x8xi32>
    %72 = tpu.iota {dimensions = array<i32: 2>} : vector<1x8x8xi32>
    %c0_i32 = arith.constant 0 : i32
    %c1_i32 = arith.constant 1 : i32
    %73 = arith.muli %c0_i32, %c1_i32 : i32
    %c0_i32_52 = arith.constant 0 : i32
    %74 = arith.addi %c0_i32_52, %73 : i32
    %c8_i32 = arith.constant 8 : i32
    %75 = arith.muli %74, %c8_i32 : i32
    %76 = tpu.assume_multiple %75, 8 : i32
    %c0_53 = arith.constant 0 : index
    %77 = arith.index_cast %76 : i32 to index
    %c0_54 = arith.constant 0 : index
    %78 = vector.load %arg5[%c0_53, %77, %c0_54] : memref<4x8x8xbf16, #tpu.memory_space<vmem>>, vector<4x8x8xbf16>
    %c0_55 = arith.constant 0 : index
    %79 = arith.index_cast %76 : i32 to index
    %c0_56 = arith.constant 0 : index
    %80 = vector.load %arg6[%c0_55, %79, %c0_56] : memref<4x8x8xbf16, #tpu.memory_space<vmem>>, vector<4x8x8xbf16>
    "tpu.trace_start"() <{level = 10 : i32, message = "htd,hkd->htk"}> : () -> ()
    %cst_57 = arith.constant dense<0.000000e+00> : vector<4x8x8xf32>
    %81 = tpu.matmul %64, %78, %cst_57 {dimension_numbers = #tpu.dot_dimension_numbers<[2], [2], [1], [1], [0, 0, 0, 1, 1, 1], [0], [0]>} : vector<4x8x8xbf16>, vector<4x8x8xbf16>, vector<4x8x8xf32> -> vector<4x8x8xf32>
    "tpu.trace_stop"() : () -> ()
    %82 = vector.broadcast %76 : i32 to vector<1x8x8xi32>
    %83 = arith.addi %72, %82 : vector<1x8x8xi32>
    %84 = arith.cmpi sle, %83, %71 : vector<1x8x8xi32>
    %cst_58 = arith.constant -1.000000e+30 : f32
    %85 = vector.shape_cast %84 : vector<1x8x8xi1> to vector<1x8x8xi1>
    %86 = vector.broadcast %85 : vector<1x8x8xi1> to vector<4x8x8xi1>
    %87 = vector.broadcast %cst_58 : f32 to vector<4x8x8xf32>
    %88 = arith.select %86, %81, %87 : vector<4x8x8xi1>, vector<4x8x8xf32>
    %c0_59 = arith.constant 0 : index
    %c0_60 = arith.constant 0 : index
    %c0_61 = arith.constant 0 : index
    %89 = vector.load %arg7[%c0_59, %c0_60, %c0_61] : memref<4x8x1xf32, #tpu.memory_space<vmem>>, vector<4x8x1xf32>
    %cst_62 = arith.constant dense<0xFF800000> : vector<4x8xf32>
    %90 = vector.multi_reduction <maximumf>, %88, %cst_62 [2] : vector<4x8x8xf32> to vector<4x8xf32>
    %91 = vector.shape_cast %90 : vector<4x8xf32> to vector<4x8x1xf32>
    %92 = arith.maximumf %89, %91 : vector<4x8x1xf32>
    %93 = arith.subf %89, %92 : vector<4x8x1xf32>
    %94 = math.exp %93 : vector<4x8x1xf32>
    %95 = vector.broadcast %92 : vector<4x8x1xf32> to vector<4x8x8xf32>
    %96 = arith.subf %88, %95 : vector<4x8x8xf32>
    %97 = math.exp %96 : vector<4x8x8xf32>
    %c0_63 = arith.constant 0 : index
    %c0_64 = arith.constant 0 : index
    %c0_65 = arith.constant 0 : index
    %98 = vector.load %arg8[%c0_63, %c0_64, %c0_65] : memref<4x8x1xf32, #tpu.memory_space<vmem>>, vector<4x8x1xf32>
    %99 = arith.mulf %94, %98 : vector<4x8x1xf32>
    %cst_66 = arith.constant dense<0.000000e+00> : vector<4x8xf32>
    %100 = vector.multi_reduction <add>, %97, %cst_66 [2] : vector<4x8x8xf32> to vector<4x8xf32>
    %101 = vector.shape_cast %100 : vector<4x8xf32> to vector<4x8x1xf32>
    %102 = arith.addf %99, %101 : vector<4x8x1xf32>
    %c0_67 = arith.constant 0 : index
    %c0_68 = arith.constant 0 : index
    %c0_69 = arith.constant 0 : index
    %103 = vector.load %arg8[%c0_67, %c0_68, %c0_69] : memref<4x8x1xf32, #tpu.memory_space<vmem>>, vector<4x8x1xf32>
    tpu.vector_store %arg8[%c0_67, %c0_68, %c0_69], %102 {strides = array<i32>} : memref<4x8x1xf32, #tpu.memory_space<vmem>>, vector<4x8x1xf32>,
    %c0_70 = arith.constant 0 : index
    %c0_71 = arith.constant 0 : index
    %c0_72 = arith.constant 0 : index
    %104 = vector.load %arg9[%c0_70, %c0_71, %c0_72] : memref<4x8x8xf32, #tpu.memory_space<vmem>>, vector<4x8x8xf32>
    %105 = vector.broadcast %94 : vector<4x8x1xf32> to vector<4x8x8xf32>
    %106 = arith.mulf %105, %104 : vector<4x8x8xf32>
    %107 = arith.truncf %97 : vector<4x8x8xf32> to vector<4x8x8xbf16>
    "tpu.trace_start"() <{level = 10 : i32, message = "htk,hkd->htd"}> : () -> ()
    %cst_73 = arith.constant dense<0.000000e+00> : vector<4x8x8xf32>
    %108 = tpu.matmul %107, %80, %cst_73 {dimension_numbers = #tpu.dot_dimension_numbers<[2], [1], [1], [2], [0, 0, 0, 1, 1, 2], [0], [0]>} : vector<4x8x8xbf16>, vector<4x8x8xbf16>, vector<4x8x8xf32> -> vector<4x8x8xf32>
    "tpu.trace_stop"() : () -> ()
    %109 = arith.addf %106, %108 : vector<4x8x8xf32>
    %c0_74 = arith.constant 0 : index
    %c0_75 = arith.constant 0 : index
    %c0_76 = arith.constant 0 : index
    %110 = vector.load %arg9[%c0_74, %c0_75, %c0_76] : memref<4x8x8xf32, #tpu.memory_space<vmem>>, vector<4x8x8xf32>
    tpu.vector_store %arg9[%c0_74, %c0_75, %c0_76], %109 {strides = array<i32>} : memref<4x8x8xf32, #tpu.memory_space<vmem>>, vector<4x8x8xf32>,
    %c0_77 = arith.constant 0 : index
    %c0_78 = arith.constant 0 : index
    %c0_79 = arith.constant 0 : index
    %111 = vector.load %arg7[%c0_77, %c0_78, %c0_79] : memref<4x8x1xf32, #tpu.memory_space<vmem>>, vector<4x8x1xf32>
    tpu.vector_store %arg7[%c0_77, %c0_78, %c0_79], %92 {strides = array<i32>} : memref<4x8x1xf32, #tpu.memory_space<vmem>>, vector<4x8x1xf32>,
    %c1_i32_80 = arith.constant 1 : i32
    %c0_81 = arith.constant 0 : index
    %c0_82 = arith.constant 0 : index
    %c0_83 = arith.constant 0 : index
    %112 = vector.load %arg9[%c0_81, %c0_82, %c0_83] : memref<4x8x8xf32, #tpu.memory_space<vmem>>, vector<4x8x8xf32>
    %c0_84 = arith.constant 0 : index
    %c0_85 = arith.constant 0 : index
    %c0_86 = arith.constant 0 : index
    %113 = vector.load %arg8[%c0_84, %c0_85, %c0_86] : memref<4x8x1xf32, #tpu.memory_space<vmem>>, vector<4x8x1xf32>
    %cst_87 = arith.constant 0.353553385 : f32
    %114 = vector.broadcast %cst_87 : f32 to vector<4x8x1xf32>
    %115 = arith.divf %114, %113 : vector<4x8x1xf32>
    %116 = vector.broadcast %115 : vector<4x8x1xf32> to vector<4x8x8xf32>
    %117 = arith.mulf %112, %116 : vector<4x8x8xf32>
    %118 = vector.extract_strided_slice %117 {offsets = [0, 0, 0], sizes = [1, 8, 8], strides = [1, 1, 1]} : vector<4x8x8xf32> to vector<1x8x8xf32>
    %119 = vector.shape_cast %118 : vector<1x8x8xf32> to vector<8x8xf32>
    %c0_88 = arith.constant 0 : index
    %c0_89 = arith.constant 0 : index
    %c0_90 = arith.constant 0 : index
    %120 = vector.load %arg3[%c0_88, %c0_89, %c0_90] : memref<1x8x32xf32, #tpu.memory_space<vmem>>, vector<1x8x8xf32>
    %121 = vector.shape_cast %120 : vector<1x8x8xf32> to vector<8x8xf32>
    %122 = vector.shape_cast %119 : vector<8x8xf32> to vector<1x8x8xf32>
    tpu.vector_store %arg3[%c0_88, %c0_89, %c0_90], %122 {strides = array<i32>} : memref<1x8x32xf32, #tpu.memory_space<vmem>>, vector<1x8x8xf32>,
    %123 = vector.extract_strided_slice %117 {offsets = [1, 0, 0], sizes = [1, 8, 8], strides = [1, 1, 1]} : vector<4x8x8xf32> to vector<1x8x8xf32>
    %124 = vector.shape_cast %123 : vector<1x8x8xf32> to vector<8x8xf32>
    %c0_91 = arith.constant 0 : index
    %c0_92 = arith.constant 0 : index
    %c8 = arith.constant 8 : index
    %125 = vector.load %arg3[%c0_91, %c0_92, %c8] : memref<1x8x32xf32, #tpu.memory_space<vmem>>, vector<1x8x8xf32>
    %126 = vector.shape_cast %125 : vector<1x8x8xf32> to vector<8x8xf32>
    %127 = vector.shape_cast %124 : vector<8x8xf32> to vector<1x8x8xf32>
    tpu.vector_store %arg3[%c0_91, %c0_92, %c8], %127 {strides = array<i32>} : memref<1x8x32xf32, #tpu.memory_space<vmem>>, vector<1x8x8xf32>,
    %128 = vector.extract_strided_slice %117 {offsets = [2, 0, 0], sizes = [1, 8, 8], strides = [1, 1, 1]} : vector<4x8x8xf32> to vector<1x8x8xf32>
    %129 = vector.shape_cast %128 : vector<1x8x8xf32> to vector<8x8xf32>
    %c0_93 = arith.constant 0 : index
    %c0_94 = arith.constant 0 : index
    %c16 = arith.constant 16 : index
    %130 = vector.load %arg3[%c0_93, %c0_94, %c16] : memref<1x8x32xf32, #tpu.memory_space<vmem>>, vector<1x8x8xf32>
    %131 = vector.shape_cast %130 : vector<1x8x8xf32> to vector<8x8xf32>
    %132 = vector.shape_cast %129 : vector<8x8xf32> to vector<1x8x8xf32>
    tpu.vector_store %arg3[%c0_93, %c0_94, %c16], %132 {strides = array<i32>} : memref<1x8x32xf32, #tpu.memory_space<vmem>>, vector<1x8x8xf32>,
    %133 = vector.extract_strided_slice %117 {offsets = [3, 0, 0], sizes = [1, 8, 8], strides = [1, 1, 1]} : vector<4x8x8xf32> to vector<1x8x8xf32>
    %134 = vector.shape_cast %133 : vector<1x8x8xf32> to vector<8x8xf32>
    %c0_95 = arith.constant 0 : index
    %c0_96 = arith.constant 0 : index
    %c24 = arith.constant 24 : index
    %135 = vector.load %arg3[%c0_95, %c0_96, %c24] : memref<1x8x32xf32, #tpu.memory_space<vmem>>, vector<1x8x8xf32>
    %136 = vector.shape_cast %135 : vector<1x8x8xf32> to vector<8x8xf32>
    %137 = vector.shape_cast %134 : vector<8x8xf32> to vector<1x8x8xf32>
    tpu.vector_store %arg3[%c0_95, %c0_96, %c24], %137 {strides = array<i32>} : memref<1x8x32xf32, #tpu.memory_space<vmem>>, vector<1x8x8xf32>,
    return
  }
  func.func @transform_0(%arg0: i32) -> (i32, i32, i32) {
    %c0_i32 = arith.constant 0 : i32
    %c0_i32_0 = arith.constant 0 : i32
    %c0_i32_1 = arith.constant 0 : i32
    return %arg0, %c0_i32, %c0_i32_0 : i32, i32, i32
  }
  func.func @transform_1(%arg0: i32) -> (i32, i32) {
    %c0_i32 = arith.constant 0 : i32
    %c0_i32_0 = arith.constant 0 : i32
    %c0_i32_1 = arith.constant 0 : i32
    return %c0_i32, %c0_i32_0 : i32, i32
  }
  func.func @transform_2(%arg0: i32) -> (i32, i32, i32) {
    %c0_i32 = arith.constant 0 : i32
    %c0_i32_0 = arith.constant 0 : i32
    %c0_i32_1 = arith.constant 0 : i32
    return %arg0, %c0_i32, %c0_i32_0 : i32, i32, i32
  }
}

</mosaic_0001>

<bundles_post_ra>
// kernel: tpu_custom_call.1
= control target key start
LH: loop header
LB: loop body
LE: loop exit
PB: predicated region body
PF: predicated region fallthrough
CT: control target
= control target key end

     0   :  { %7 = vsyncpa [#allocation9], 0  ;;  %s1735_s0 = inlined_call_operand.hbm [shape: bf16[2,8,32], index: 0, kind: input, shape index: {}]   ;;  %s1736_s1 = inlined_call_operand.hbm [shape: bf16[32,96], index: 1, kind: input, shape index: {}]   ;;  %s1737_s2 = inlined_call_operand.hbm [shape: f32[2,8,32], index: 2, kind: output, shape index: {}]  }
   0x1   :  { %9 = vsyncpa [#allocation9 + $0x1], 0 }
   0x2   :  { %10 = vsyncpa [#allocation12], 0 }
   0x3   :  { %11 = vsyncpa [#allocation10], 0 }
   0x4   :  { %13 = vsyncpa [#allocation10 + $0x1], 0  ;;  %s1367_s9 = smov 0   ;;  %s1369_s10 = smov 0  }
   0x5   :  { %s1371_s11 = smov 0   ;;  %s1373_s12 = smov 0  }
   0x6 LB: > { %s1388_s13 = sadd.s32 4294967295, %s1327_s12   ;;  %s992_s14 = sadd.s32 4294967294, %s1327_s12   ;;  %s1327_s12 = sphi %s1373_s12, %s1757_s12   ;;  %s1323_s11 = sphi %s1371_s11, %s1756_s11   ;;  %s1319_s10 = sphi %s1369_s10, %s1755_s10   ;;  %s1315_s9 = sphi %s1367_s9, %s1754_s9  }
   0x7   : > { %p39_p0 = scmp.ne.s32.totalorder %s1319_s10, %s1315_s9  ;;  %p1738_p1 = scmp.eq.s32.totalorder %s1388_s13, 0 }
   0x8   : > { %p90_p3 = scmp.eq.s32.totalorder %s992_s14, 1  ;;  %p993_p5 = scmp.ge.s32.totalorder %s1327_s12, 1 }
   0x9   : > { %p1397_p4 = por %p1738_p1, %p39_p0  ;;  %p97_p7 = scmp.lt.s32.totalorder %s1327_s12, 3 }
   0xa   : > { %p1402_p6 = por %p90_p3, %p39_p0  ;;  %s1329_s18 = smov [#allocation11]  }
   0xb   : > { %s1741_s15 = scalar_select %p1397_p4, 1, 0 }
   0xc   : > { %s1742_s16 = scalar_select %p1402_p6, 1, 0 }
   0xd   : > { %p1407_p8 = pnand %p993_p5, %p97_p7  ;;  %s109_s19 = sshll.u32 %s1329_s18, 4  ;;  %s1411_s19 = int_to_ptr.vmem [resolvable:$true] %s109_s19 }
   0xe   : > { %s1423_s21 = sadd.s32 1, %s1327_s12   ;;  %s26_s22 = sadd.s32 1, %s1323_s11 }
   0xf   : > { %s1743_s17 = scalar_select %p1407_p8, 1, 0 }
  0x10   : > { %p1102_p9 = pneg %p1407_p8  ;;  %s23_s23 = ssub.s32 %s1327_s12, %s1423_s21 }
  0x11   : > { %s1199_s26 = scalar_lea.hbm %s1736_s1, 256 }
  0x12   : > { %p1418_p11 = pnand %p1102_p9, %p1738_p1  ;;  %p1200_p12 = scmp.ne.s32.totalorder %s1736_s1, %s1199_s26 }
  0x13   : > { %p1206_p5 = scmp.lt.u32.totalorder %s1199_s26, %s1736_s1 }
  0x14   : > { %p1201_p13 = pneg %p1418_p11 }
  0x16   : > { %p1202_p0 = pnand %p1201_p13, %p1200_p12 }
  0x18   : > { %p1203_p3 = pneg %p1202_p0 }
  0x1a   : > { %p1208_p7 = pnand %p1206_p5, %p1203_p3 }
  0x1c   : > { %1211 = shalt.err (!%p1208_p7)
}
  0x1d   : > { %s1212_s3 = scalar_lea.vmem %s1411_s19, 256  ;;  %p1220_p2 = scmp.lt.s32.totalorder %s1411_s19, %s1411_s19 }
  0x1e   : > { %p1213_p9 = scmp.ne.s32.totalorder %s1411_s19, %s1212_s3  ;;  %p1221_p6 = scmp.lt.s32.totalorder %s1212_s3, %s1212_s3 }
  0x20   : > { %p1215_p10 = pnand %p1213_p9, %p1201_p13  ;;  %p1222_p4 = por %p1221_p6, %p1220_p2 }
  0x22   : > { %p1216_p1 = pneg %p1215_p10 }
  0x24   : > { %p1223_p8 = pnand %p1222_p4, %p1216_p1 }
  0x26   : > { %1226 = shalt.err (!%p1223_p8)
}
  0x27   : > { %s1330_s4 = smov 64   ;;  %s1331_s5 = smov 4  }
  0x28   : > { %1105 = dma.hbm_to_vmem [thread:$0]  (!%p1418_p11), %s1736_s1, 256, %s1411_s19, [#allocation12], %s1330_s4, %s1330_s4, %s1331_s5  }
  0x29   : > { %p24_p2 = scmp.eq.s32.totalorder %s23_s23, 0  ;;  %p33_p1 = scmp.ne.s32.totalorder %s1323_s11, %s1319_s10 }
  0x2a   : > { %p34_p4 = scmp.eq.s32.totalorder %s1327_s12, 0  ;;  %p1115_p6 = scmp.lt.s32.totalorder %s1327_s12, 2 }
  0x2b   : > { %s1454_s8 = scalar_select %p24_p2, %s1323_s11, %s26_s22  }
  0x2c   : > { %p35_p8 = por %p34_p4, %p33_p1  ;;  %p1745_p10 = scmp.eq.s32.totalorder %s1388_s13, 1 }
  0x2d   : > { %s123_s18 = sand.u32 1, %s1323_s11   ;;  %s997_s24 = sshll.u32 %s1327_s12, 6 }
  0x2e   : > { %p1458_p12 = por %p1745_p10, %p33_p1  ;;  %s996_s25 = sshll.u32 %s123_s18, 2 }
  0x2f   : > { %s1467_s27 = scalar_lea.hbm %s1735_s0, %s997_s24  ;;  %s127_s19 = scalar_lea.vmem [#allocation8], %s996_s25 }
  0x30   : > { %s134_s22 = sshll.u32 %s127_s19, 4  ;;  %p1469_p11 = pnand %p1115_p6, %p35_p8  ;;  %s1473_s22 = int_to_ptr.vmem [resolvable:$true] %s134_s22 }
  0x31   : > { %s124_s28 = scalar_lea.sflag [#allocation9], %s123_s18  ;;  %s1227_s29 = scalar_lea.hbm %s1467_s27, 64 }
  0x32   : > { %p1228_p13 = scmp.ne.s32.totalorder %s1467_s27, %s1227_s29  ;;  %p1229_p0 = pneg %p1469_p11 }
  0x33   : > { %s1232_s4 = scalar_lea.hbm %s1735_s0, 128  ;;  %p1233_p7 = scmp.lt.u32.totalorder %s1467_s27, %s1735_s0 }
  0x34   : > { %p1230_p3 = pnand %p1229_p0, %p1228_p13  ;;  %p1234_p9 = scmp.lt.u32.totalorder %s1232_s4, %s1227_s29 }
  0x35   : > { %p1236_p1 = scmp.lt.u32.totalorder %s1227_s29, %s1467_s27 }
  0x36   : > { %p1231_p5 = pneg %p1230_p3  ;;  %p1235_p2 = por %p1234_p9, %p1233_p7 }
  0x38   : > { %p1237_p4 = por %p1236_p1, %p1235_p2 }
  0x3a   : > { %p1238_p6 = pnand %p1237_p4, %p1231_p5 }
  0x3c   : > { %1241 = shalt.err (!%p1238_p6)
}
  0x3d   : > { %s1242_s7 = scalar_lea.vmem %s1473_s22, 64  ;;  %s1332_s18 = smov [#allocation8]  }
  0x3e   : > { %p1243_p8 = scmp.ne.s32.totalorder %s1473_s22, %s1242_s7  ;;  %s1247_s24 = sshll.u32 %s1332_s18, 4  ;;  %s1248_s24 = int_to_ptr.vmem [resolvable:$false] %s1247_s24 }
  0x3f   : > { %s1249_s25 = scalar_lea.vmem %s1248_s24, 128  ;;  %p1250_p3 = scmp.lt.s32.totalorder %s1473_s22, %s1248_s24 }
  0x40   : > { %p1245_p10 = pnand %p1243_p8, %p1229_p0  ;;  %p1251_p7 = scmp.lt.s32.totalorder %s1249_s25, %s1242_s7 }
  0x42   : > { %p1246_p13 = pneg %p1245_p10  ;;  %p1252_p9 = por %p1251_p7, %p1250_p3 }
  0x44   : > { %p1253_p2 = pnand %p1252_p9, %p1246_p13 }
  0x46   : > { %1256 = shalt.err (!%p1253_p2)
}
  0x47   : > { %1109 = dma.hbm_to_vmem [thread:$0]  (!%p1469_p11), %s1467_s27, 64, %s1473_s22, %s124_s28  }
  0x48   : > { %p1748_p5 = scmp.ne.s32.totalorder %s1743_s17, 0 }
  0x49   : > { %s1503_s20 = sand.u32 (!%p1748_p5), 1, %s1319_s10   ;;  %p1749_p0 = scmp.ne.s32.totalorder (!%p1748_p5), %s1741_s15, 0 }
  0x4a   : > { %143 = sbr.rel (%p1748_p5) target bundleno = 1378 (0x562), region = 28  ;;  %s999_s26 = sshll.u32 (!%p1748_p5), %s1503_s20, 2 }
  0x4b   : > { %s146_s19 = scalar_lea.sflag (!%p1748_p5), [#allocation9], %s1503_s20  ;;  %s149_s29 = scalar_lea.vmem (!%p1748_p5), [#allocation8], %s999_s26 }
  0x51   : > { %1302 = dma.done.wait (%p1749_p0), %s146_s19, 64  }
  0x52   : > { %1304 = vsyncadd (%p1749_p0), %s146_s19, 4294967232  ;;  %p1750_p1 = scmp.eq.s32.totalorder %s1388_s13, 0 }
  0x54   : > { %1306 = dma.done.wait (%p1750_p1), [#allocation12], 256   ;;  %p1751_p11 = pmov %p1750_p1 }
  0x55   : > { %v1333_v0 = vmov 0.0   ;;  %vm1334_vm0 = vmmov 0   ;;  %v1173_v1 = vld [vmem:[#allocation11] sm:$0xff]   ;;  %v1174_v2 = vld [vmem:[#allocation11 + $0x8] sm:$0xff]   ;;  %v175_v3 = vld [vmem:[%s149_s29] sm:$0xf]  ;;  %v313_v29 = vlaneseq }
  0x56   : > { %1308 = vsyncadd (%p1751_p11), [#allocation12], 4294967040  ;;  %1038 = vmatprep.subr.bf16.mxu0 %v1333_v0  ;;  %1042 = vmatprep.mubr.msk.bf16.mxu0 %vm1334_vm0, %v1333_v0  ;;  %vm192_vm1 = vcmask 261120   ;;  %vm308_vm2 = vcmask 64512   ;;  %vm237_vm3 = vcmask 60416   ;;  %s1335_s15 = smov 80  }
  0x57   : > { %1046 = vmatprep.subr.bf16.mxu1 %v1333_v0  ;;  %1048 = vmatprep.mubr.msk.bf16.mxu1 %vm1334_vm0, %v1333_v0  ;;  %309 = vst.msk [vmem:[#allocation7] sm:$0xff] %vm308_vm2, %v1333_v0  ;;  %310 = vst.msk [vmem:[#allocation7 + $0x8] sm:$0xff] %vm308_vm2, %v1333_v0  ;;  %s1336_s17 = smov 96   ;;  %s1337_s27 = smov 120   ;;  %vm299_vm4 = vcmask 7168   ;;  %v314_v30 = vshrl.u32 %v313_v29, 7 }
  0x58   : > { %1039 = vmatpush3.bf16.msra.mxu0 %v1173_v1  ;;  %311 = vst.msk [vmem:[#allocation7 + $0x10] sm:$0xff] %vm308_vm2, %v1333_v0  ;;  %312 = vst.msk [vmem:[#allocation7 + $0x18] sm:$0xff] %vm308_vm2, %v1333_v0  ;;  %s1338_s22 = smov 88   ;;  %s1339_s23 = smov 112   ;;  %v1342_v28 = vmov -1e+30  }
  0x59   : > { %1040 = vmatprep.subr.bf16.mxu0 %v1333_v0  ;;  %s1340_s28 = smov 72   ;;  %s1341_s30 = smov 104   ;;  %300 = vst.msk [vmem:[#allocation5] sm:$0xff] %vm299_vm4, %v1342_v28  ;;  %301 = vst.msk [vmem:[#allocation5 + $0x8] sm:$0xff] %vm299_vm4, %v1342_v28  ;;  %v316_v31 = vand.u32 127, %v313_v29  ;;  %v1343_v56 = vmov 0  }
  0x5a   : > { %302 = vst.msk [vmem:[#allocation5 + $0x10] sm:$0xff] %vm299_vm4, %v1342_v28  ;;  %303 = vst.msk [vmem:[#allocation5 + $0x18] sm:$0xff] %vm299_vm4, %v1342_v28  ;;  %1171 = vset.pattern.permute.xlu0 %v1343_v56  ;;  %1172 = vset.pattern.permute.xlu1 %v1343_v56  ;;  %s1344_s3 = smov 64   ;;  %s1345_s4 = smov 56   ;;  %vm645_vm6 = vcmask 1043456   ;;  %vm884_vm7 = vcmask 130112  }
  0x5b   : > { %304 = vst.msk [vmem:[#allocation6] sm:$0xff] %vm299_vm4, %v1333_v0  ;;  %305 = vst.msk [vmem:[#allocation6 + $0x8] sm:$0xff] %vm299_vm4, %v1333_v0  ;;  %vm511_vm5 = vcmp.le.s32.totalorder %v316_v31, %v314_v30  ;;  %s1346_s5 = smov 48   ;;  %s1347_s6 = smov 40   ;;  %vm890_vm8 = vcmask 195712   ;;  %vm896_vm9 = vcmask 261312  }
  0x5c   : > { %1041 = vmatpush3.bf16.msra.mxu0 %v1174_v2  ;;  %306 = vst.msk [vmem:[#allocation6 + $0x10] sm:$0xff] %vm299_vm4, %v1333_v0  ;;  %307 = vst.msk [vmem:[#allocation6 + $0x18] sm:$0xff] %vm299_vm4, %v1333_v0  ;;  %s1348_s7 = smov 8   ;;  %s1349_s18 = smov 16  }
  0x5d   : > { %1052 = vmatprep.subr.bf16.mxu0 %v1333_v0  ;;  %s1350_s24 = smov 24   ;;  %s1001_s25 = sshll.u32 %s1503_s20, 3 }
  0x5e   : > { %s173_s26 = scalar_lea.vmem [#allocation13], %s1001_s25  ;;  %s1015_s19 = sshll.u32 %s1388_s13, 7 }
  0x5f   : > { %1043 = vmatmul.mubr.msk.bf16.vlgmr.msra.gmra.mrb[0].mxu0 %vm192_vm1, %v175_v3  ;;  %s912_s29 = sshll.u32 %s173_s26, 4  ;;  %s1351_s13 = smov [#allocation13]   ;;  %s1693_s29 = int_to_ptr.vmem [resolvable:$true] %s912_s29 }
  0x60   : > { %1054 = vmatprep.mubr.msk.bf16.mxu0 %vm1334_vm0, %v1333_v0  ;;  %v1604_v57 = vld [vmem:[#allocation5] sm:$0xff]  ;;  %v1609_v60 = vld [vmem:[#allocation5 + $0x8] sm:$0xff] }
  0x61   : > { %v1619_v1 = vld [vmem:[#allocation5 + $0x10] sm:$0xff] }
  0x63   : > { %v584_v56 = vld [vmem:[#allocation6 + $0x10] sm:$0xff] }
 0x132   : > { %v230_v4 = vpop.f32.mrb[0].mxu0 }
 0x133   : > { %v1533_v5 = vpack.c.bf16 %v230_v4, %v230_v4  ;;  %v1044_v6 = vpop.f32.mrb[1].mxu0 }
 0x134   : > { %v233_v7 = vpop.f32.mrb[2].mxu0  ;;  %v1627_v6 = vld [vmem:[#allocation5 + $0x18] sm:$0xff] }
 0x135   : > { %270 = vrot.lane.b32.xlu1 %v1533_v5, %s1335_s15  ;;  %242 = vrot.lane.b32.xlu0 %v1533_v5, %s1336_s17  ;;  %v1045_v8 = vpop.f32.mrb[3].mxu0  ;;  %238 = vst.msk [vmem:[#allocation2] sm:$0xf] %vm237_vm3, %v1533_v5 }
 0x139   : > { %250 = vrot.lane.b32.xlu1 %v1533_v5, %s1337_s27  ;;  %255 = vrot.lane.b32.xlu0 %v1533_v5, %s1338_s22  ;;  %s1691_s27 = scalar_lea.hbm %s1737_s2, %s1015_s19  ;;  %s899_s22 = scalar_lea.sflag [#allocation10], %s1503_s20 }
 0x13c   : > { %v295_v21 = vld [vmem:[#allocation2] sm:$0xf] }
 0x13d   : > { %265 = vrot.lane.b32.xlu1 %v1533_v5, %s1339_s23  ;;  %285 = vrot.lane.b32.xlu0 %v1533_v5, %s1340_s28  ;;  %s1257_s23 = scalar_lea.vmem %s1693_s29, 128  ;;  %s1261_s28 = sshll.u32 %s1351_s13, 4  ;;  %s1262_s28 = int_to_ptr.vmem [resolvable:$false] %s1261_s28 }
 0x13e   : > { %p1258_p4 = scmp.ne.s32.totalorder %s1693_s29, %s1257_s23  ;;  %p1264_p10 = scmp.lt.s32.totalorder %s1693_s29, %s1262_s28 }
 0x140   : > { %p1259_p6 = pnand %p1258_p4, %p1458_p12 }
 0x141   : > { %280 = vrot.lane.b32.xlu0 %v1533_v5, %s1341_s30  ;;  %s1263_s30 = scalar_lea.vmem %s1262_s28, 256 }
 0x142   : > { %p1260_p8 = pneg %p1259_p6  ;;  %p1265_p13 = scmp.lt.s32.totalorder %s1263_s30, %s1257_s23 }
 0x144   : > { %p1266_p3 = por %p1265_p13, %p1264_p10 }
 0x146   : > { %p1267_p7 = pnand %p1266_p3, %p1260_p8 }
 0x1a7   : > { %v271_v9 = vpop.permute.xlu1 %270  ;;  %v243_v10 = vpop.permute.xlu0 %242 }
 0x1a8   : > { %274 = vst.msk [vmem:[#allocation3 + $0x8] sm:$0xf] %vm237_vm3, %v271_v9  ;;  %245 = vst.msk [vmem:[#allocation3] sm:$0xf] %vm237_vm3, %v243_v10 }
 0x1ab   : > { %v251_v11 = vpop.permute.xlu1 %250  ;;  %v256_v12 = vpop.permute.xlu0 %255 }
 0x1ac   : > { %254 = vst.msk [vmem:[#allocation2 + $0x4] sm:$0xf] %vm237_vm3, %v251_v11  ;;  %259 = vst.msk [vmem:[#allocation3 + $0x4] sm:$0xf] %vm237_vm3, %v256_v12 }
 0x1af   : > { %v266_v13 = vpop.permute.xlu1 %265  ;;  %v286_v14 = vpop.permute.xlu0 %285  ;;  %v317_v15 = vld [vmem:[#allocation3] sm:$0xf]  ;;  %v319_v20 = vld [vmem:[#allocation3 + $0x8] sm:$0xf] }
 0x1b0   : > { %269 = vst.msk [vmem:[#allocation2 + $0x8] sm:$0xf] %vm237_vm3, %v266_v13  ;;  %289 = vst.msk [vmem:[#allocation3 + $0xc] sm:$0xf] %vm237_vm3, %v286_v14  ;;  %v329_v16 = vsel %vm308_vm2, %v317_v15, 0  ;;  %v421_v22 = vsel %vm308_vm2, %v319_v20, 0 }
 0x1b1   : > { %1047 = vmatpush3.bf16.xpose.msra.mxu1 %v329_v16 }
 0x1b2   : > { %1058 = vmatprep.subr.bf16.mxu1 %v1333_v0 }
 0x1b3   : > { %v281_v17 = vpop.permute.xlu0 %280  ;;  %v318_v18 = vld [vmem:[#allocation3 + $0x4] sm:$0xf]  ;;  %v296_v24 = vld [vmem:[#allocation2 + $0x4] sm:$0xf] }
 0x1b4   : > { %284 = vst.msk [vmem:[#allocation2 + $0xc] sm:$0xf] %vm237_vm3, %v281_v17  ;;  %v375_v19 = vsel %vm308_vm2, %v318_v18, 0 }
 0x1b5   : > { %1053 = vmatpush3.bf16.xpose.msra.mxu0 %v375_v19 }
 0x1b6   : > { %1064 = vmatprep.subr.bf16.mxu0 %v1333_v0 }
 0x1b7   : > { %v320_v23 = vld [vmem:[#allocation3 + $0xc] sm:$0xf]  ;;  %v297_v26 = vld [vmem:[#allocation2 + $0x8] sm:$0xf] }
 0x1b8   : > { %1049 = vmatmul.mubr.msk.bf16.vlgmr.msra.gmra.mrb[0].mxu1 %vm308_vm2, %v295_v21  ;;  %v467_v25 = vsel %vm308_vm2, %v320_v23, 0 }
 0x1b9   : > { %1059 = vmatpush3.bf16.xpose.msra.mxu1 %v421_v22  ;;  %1060 = vmatprep.mubr.msk.bf16.mxu1 %vm1334_vm0, %v1333_v0 }
 0x1ba   : > { %1070 = vmatprep.subr.bf16.mxu1 %v1333_v0 }
 0x1bb   : > { %v298_v27 = vld [vmem:[#allocation2 + $0xc] sm:$0xf] }
 0x1bc   : > { %1055 = vmatmul.mubr.msk.bf16.vlgmr.msra.gmra.mrb[4].mxu0 %vm308_vm2, %v296_v24 }
 0x1bd   : > { %1065 = vmatpush3.bf16.xpose.msra.mxu0 %v467_v25  ;;  %1066 = vmatprep.mubr.msk.bf16.mxu0 %vm1334_vm0, %v1333_v0 }
 0x1be   : > { %1076 = vmatprep.subr.bf16.mxu0 %v1333_v0 }
 0x1c0   : > { %1061 = vmatmul.mubr.msk.bf16.vlgmr.msra.gmra.mrb[4].mxu1 %vm308_vm2, %v297_v26 }
 0x1c1   : > { %1072 = vmatprep.mubr.msk.bf16.mxu1 %vm1334_vm0, %v1333_v0 }
 0x1c4   : > { %1067 = vmatmul.mubr.msk.bf16.vlgmr.msra.gmra.mrb[8].mxu0 %vm308_vm2, %v298_v27 }
 0x1c5   : > { %1078 = vmatprep.mubr.msk.bf16.mxu0 %vm1334_vm0, %v1333_v0 }
 0x28b   : > { %v365_v32 = vpop.f32.mrb[0].mxu1 }
 0x28c   : > { %v1584_v33 = vsel %vm511_vm5, %v365_v32, -1e+30  ;;  %v1050_v34 = vpop.f32.mrb[1].mxu1 }
 0x28d   : > { %v368_v35 = vpop.f32.mrb[2].mxu1  ;;  %v522_v36 = vsel %vm308_vm2, %v1584_v33, -inf }
 0x28e   : > { %523 = vmax.xlane.f32.xlu1 %v522_v36  ;;  %v1051_v37 = vpop.f32.mrb[3].mxu1 }
 0x28f   : > { %v411_v38 = vpop.f32.mrb[4].mxu0 }
 0x290   : > { %v1589_v39 = vsel %vm511_vm5, %v411_v38, -1e+30  ;;  %v1056_v40 = vpop.f32.mrb[5].mxu0 }
 0x291   : > { %v414_v41 = vpop.f32.mrb[6].mxu0  ;;  %v525_v42 = vsel %vm308_vm2, %v1589_v39, -inf }
 0x292   : > { %526 = vmax.xlane.f32.xlu0 %v525_v42  ;;  %v1057_v43 = vpop.f32.mrb[7].mxu0 }
 0x293   : > { %v457_v44 = vpop.f32.mrb[4].mxu1 }
 0x294   : > { %v1594_v45 = vsel %vm511_vm5, %v457_v44, -1e+30  ;;  %v1062_v46 = vpop.f32.mrb[5].mxu1 }
 0x295   : > { %v460_v47 = vpop.f32.mrb[6].mxu1  ;;  %v528_v48 = vsel %vm308_vm2, %v1594_v45, -inf }
 0x296   : > { %v1063_v49 = vpop.f32.mrb[7].mxu1  ;;  %529 = vmax.xlane.f32.xlu0 %v528_v48 }
 0x297   : > { %v503_v50 = vpop.f32.mrb[8].mxu0 }
 0x298   : > { %v1599_v51 = vsel %vm511_vm5, %v503_v50, -1e+30  ;;  %v1068_v52 = vpop.f32.mrb[9].mxu0 }
 0x299   : > { %v506_v53 = vpop.f32.mrb[10].mxu0  ;;  %v531_v54 = vsel %vm308_vm2, %v1599_v51, -inf  ;;  %v583_v52 = vld [vmem:[#allocation6 + $0x8] sm:$0xff] }
 0x29a   : > { %532 = vmax.xlane.f32.xlu1 %v531_v54  ;;  %v1069_v55 = vpop.f32.mrb[11].mxu0 }
 0x2ab   : > { %246 = vrot.lane.b32.xlu1 %v1533_v5, %s1344_s3 }
 0x31b   : > { %v524_v58 = vpop.xlane.xlu1 %523 }
 0x31c   : > { %v1607_v59 = vmax.f32 %v1604_v57, %v524_v58  ;;  %v582_v58 = vld [vmem:[#allocation6] sm:$0xff] }
 0x31e   : > { %v538_v61 = vsub.f32 %v1604_v57, %v1607_v59  ;;  %835 = vst.msk [vmem:[#allocation5] sm:$0xff] %vm299_vm4, %v1607_v59  ;;  %552 = vperm.xlu0 %1171, %v1607_v59  }
 0x31f   : > { %v527_v62 = vpop.xlane.xlu0 %526 }
 0x320   : > { %v1617_v63 = vmax.f32 %v1609_v60, %v527_v62 }
 0x322   : > { %v539_v2 = vsub.f32 %v1609_v60, %v1617_v63  ;;  %836 = vst.msk [vmem:[#allocation5 + $0x8] sm:$0xff] %vm299_vm4, %v1617_v63  ;;  %557 = vperm.xlu1 %1172, %v1617_v63  }
 0x323   : > { %v530_v3 = vpop.xlane.xlu0 %529 }
 0x324   : > { %v536_v4 = vmax.f32 %v1619_v1, %v530_v3  ;;  %v544_v48 = vmul.f32 1.442695, %v539_v2  ;;  %v585_v3 = vld [vmem:[#allocation6 + $0x18] sm:$0xff] }
 0x326   : > { %v540_v7 = vsub.f32 %v1619_v1, %v536_v4  ;;  %837 = vst.msk [vmem:[#allocation5 + $0x10] sm:$0xff] %vm299_vm4, %v536_v4  ;;  %562 = vperm.xlu1 %1172, %v536_v4  }
 0x327   : > { %v533_v8 = vpop.xlane.xlu1 %532 }
 0x328   : > { %v1632_v9 = vmax.f32 %v1627_v6, %v533_v8  ;;  %v546_v38 = vmul.f32 1.442695, %v540_v7 }
 0x32a   : > { %v541_v10 = vsub.f32 %v1627_v6, %v1632_v9  ;;  %838 = vst.msk [vmem:[#allocation5 + $0x18] sm:$0xff] %vm299_vm4, %v1632_v9  ;;  %567 = vperm.xlu1 %1172, %v1632_v9  }
 0x32b   : > { %v247_v11 = vpop.permute.xlu1 %246 }
 0x32c   : > { %249 = vst.msk [vmem:[#allocation4] sm:$0xf] %vm237_vm3, %v247_v11  ;;  %v548_v43 = vmul.f32 1.442695, %v541_v10 }
 0x32e   : > { %260 = vrot.lane.b32.xlu1 %v1533_v5, %s1345_s4 }
 0x332   : > { %275 = vrot.lane.b32.xlu1 %v1533_v5, %s1346_s5 }
 0x333   : > { %v321_v12 = vld [vmem:[#allocation4] sm:$0xf] }
 0x334   : > { %v647_v13 = vsel %vm645_vm6, %v321_v12, 0 }
 0x335   : > { %1071 = vmatpush3.bf16.msra.mxu1 %v647_v13 }
 0x336   : > { %290 = vrot.lane.b32.xlu1 %v1533_v5, %s1347_s6  ;;  %1082 = vmatprep.subr.bf16.mxu1 %v1333_v0 }
 0x39d   : > { %v553_v14 = vpop.permute.xlu0 %552 }
 0x39e   : > { %v570_v15 = vsub.f32 %v1584_v33, %v553_v14 }
 0x3a0   : > { %v574_v16 = vmul.f32 1.442695, %v570_v15 }
 0x3a1   : > { %v558_v17 = vpop.permute.xlu1 %557 }
 0x3a2   : > { %1175 = vpow2.f32 %v574_v16  ;;  %v571_v18 = vsub.f32 %v1589_v39, %v558_v17 }
 0x3a4   : > { %v576_v19 = vmul.f32 1.442695, %v571_v18 }
 0x3a5   : > { %v563_v20 = vpop.permute.xlu1 %562 }
 0x3a6   : > { %1177 = vpow2.f32 %v576_v19  ;;  %v572_v21 = vsub.f32 %v1594_v45, %v563_v20 }
 0x3a8   : > { %v578_v22 = vmul.f32 1.442695, %v572_v21 }
 0x3a9   : > { %v568_v23 = vpop.permute.xlu1 %567 }
 0x3aa   : > { %1179 = vpow2.f32 %v578_v22  ;;  %v573_v5 = vsub.f32 %v1599_v51, %v568_v23  ;;  %v542_v51 = vmul.f32 1.442695, %v538_v61  ;;  %v611_v23 = vld [vmem:[#allocation7 + $0x8] sm:$0xff] }
 0x3ac   : > { %v1176_v24 = vpop.eup %1175  ;;  %v580_v25 = vmul.f32 1.442695, %v573_v5 }
 0x3ad   : > { %v261_v26 = vpop.permute.xlu1 %260  ;;  %v638_v27 = vpack.c.bf16 %v1176_v24, %v1176_v24  ;;  %v590_v33 = vsel %vm308_vm2, %v1176_v24, 0.0 }
 0x3ae   : > { %1181 = vpow2.f32 %v580_v25  ;;  %264 = vst.msk [vmem:[#allocation4 + $0x4] sm:$0xf] %vm237_vm3, %v261_v26  ;;  %v612_v26 = vld [vmem:[#allocation7 + $0x10] sm:$0xff] }
 0x3af   : > { %1073 = vmatmul.mubr.msk.bf16.vlgmr.msra.gmra.mrb[8].mxu1 %vm308_vm2, %v638_v27  ;;  %1183 = vpow2.f32 %v546_v38 }
 0x3b0   : > { %v1178_v28 = vpop.eup %1177  ;;  %1084 = vmatprep.mubr.msk.bf16.mxu1 %vm1334_vm0, %v1333_v0  ;;  %1185 = vpow2.f32 %v548_v43 }
 0x3b1   : > { %v276_v29 = vpop.permute.xlu1 %275  ;;  %v593_v30 = vsel %vm308_vm2, %v1178_v28, 0.0  ;;  %v639_v39 = vpack.c.bf16 %v1178_v28, %v1178_v28  ;;  %1187 = vpow2.f32 %v544_v48 }
 0x3b2   : > { %279 = vst.msk [vmem:[#allocation4 + $0x8] sm:$0xf] %vm237_vm3, %v276_v29  ;;  %594 = vadd.xlane.f32.xlu1 %v593_v30  ;;  %1189 = vpow2.f32 %v542_v51  ;;  %v610_v51 = vld [vmem:[#allocation7] sm:$0xff] }
 0x3b4   : > { %v1180_v31 = vpop.eup %1179 }
 0x3b5   : > { %v291_v32 = vpop.permute.xlu1 %290  ;;  %v596_v34 = vsel %vm308_vm2, %v1180_v31, 0.0  ;;  %v322_v35 = vld [vmem:[#allocation4 + $0x4] sm:$0xf]  ;;  %v640_v44 = vpack.c.bf16 %v1180_v31, %v1180_v31 }
 0x3b6   : > { %294 = vst.msk [vmem:[#allocation4 + $0xc] sm:$0xf] %vm237_vm3, %v291_v32  ;;  %591 = vadd.xlane.f32.xlu1 %v590_v33  ;;  %597 = vadd.xlane.f32.xlu0 %v596_v34  ;;  %v693_v36 = vsel %vm645_vm6, %v322_v35, 0  ;;  %v613_v33 = vld [vmem:[#allocation7 + $0x18] sm:$0xff] }
 0x3b7   : > { %1077 = vmatpush3.bf16.msra.mxu0 %v693_v36 }
 0x3b8   : > { %v1182_v37 = vpop.eup %1181  ;;  %1088 = vmatprep.subr.bf16.mxu0 %v1333_v0 }
 0x3b9   : > { %v599_v40 = vsel %vm308_vm2, %v1182_v37, 0.0  ;;  %v323_v41 = vld [vmem:[#allocation4 + $0x8] sm:$0xf]  ;;  %v641_v47 = vpack.c.bf16 %v1182_v37, %v1182_v37 }
 0x3ba   : > { %600 = vadd.xlane.f32.xlu0 %v599_v40  ;;  %1079 = vmatmul.mubr.msk.bf16.vlgmr.msra.gmra.mrb[12].mxu0 %vm308_vm2, %v639_v39  ;;  %v739_v42 = vsel %vm645_vm6, %v323_v41, 0 }
 0x3bb   : > { %1083 = vmatpush3.bf16.msra.mxu1 %v739_v42  ;;  %1090 = vmatprep.mubr.msk.bf16.mxu0 %vm1334_vm0, %v1333_v0  ;;  %v1184_v0 = vpop.eup %1183 }
 0x3bc   : > { %v1186_v49 = vpop.eup %1185  ;;  %v588_v62 = vmul.f32 %v1184_v0, %v584_v56 }
 0x3bd   : > { %v324_v45 = vld [vmem:[#allocation4 + $0xc] sm:$0xf]  ;;  %v1188_v50 = vpop.eup %1187  ;;  %v589_v57 = vmul.f32 %v1186_v49, %v585_v3 }
 0x3be   : > { %1085 = vmatmul.mubr.msk.bf16.vlgmr.msra.gmra.mrb[12].mxu1 %vm308_vm2, %v640_v44  ;;  %v785_v46 = vsel %vm645_vm6, %v324_v45, 0  ;;  %v587_v53 = vmul.f32 %v1188_v50, %v583_v52  ;;  %v1190_v54 = vpop.eup %1189 }
 0x3bf   : > { %1089 = vmatpush3.bf16.msra.mxu0 %v785_v46  ;;  %v586_v63 = vmul.f32 %v1190_v54, %v582_v58 }
 0x3c2   : > { %1091 = vmatmul.mubr.msk.bf16.vlgmr.msra.gmra.mrb[16].mxu0 %vm308_vm2, %v641_v47 }
 0x3c7   : > { %626 = vperm.xlu1 %1172, %v1184_v0  }
 0x3cb   : > { %631 = vperm.xlu1 %1172, %v1186_v49  }
 0x3d0   : > { %621 = vperm.xlu0 %1171, %v1188_v50  }
 0x43f   : > { %v595_v55 = vpop.xlane.xlu1 %594 }
 0x440   : > { %v603_v60 = vadd.f32 %v595_v55, %v587_v53 }
 0x442   : > { %607 = vst.msk [vmem:[#allocation6 + $0x8] sm:$0xff] %vm299_vm4, %v603_v60 }
 0x443   : > { %v598_v1 = vpop.xlane.xlu0 %597  ;;  %v592_v2 = vpop.xlane.xlu1 %591 }
 0x444   : > { %v604_v4 = vadd.f32 %v598_v1, %v588_v62  ;;  %v602_v6 = vadd.f32 %v592_v2, %v586_v63 }
 0x446   : > { %608 = vst.msk [vmem:[#allocation6 + $0x10] sm:$0xff] %vm299_vm4, %v604_v4  ;;  %606 = vst.msk [vmem:[#allocation6] sm:$0xff] %vm299_vm4, %v602_v6 }
 0x447   : > { %v601_v59 = vpop.xlane.xlu0 %600  ;;  %v627_v24 = vpop.permute.xlu1 %626 }
 0x448   : > { %v605_v61 = vadd.f32 %v601_v59, %v589_v57  ;;  %v636_v31 = vmul.f32 %v627_v24, %v612_v26 }
 0x449   : > { %v844_v7 = vld [vmem:[#allocation6 + $0x8] sm:$0xff] }
 0x44a   : > { %609 = vst.msk [vmem:[#allocation6 + $0x18] sm:$0xff] %vm299_vm4, %v605_v61  ;;  %1191 = vrcp.f32 %v844_v7 }
 0x44b   : > { %v632_v34 = vpop.permute.xlu1 %631 }
 0x44c   : > { %v637_v39 = vmul.f32 %v632_v34, %v613_v33 }
 0x44d   : > { %v845_v8 = vld [vmem:[#allocation6 + $0x10] sm:$0xff]  ;;  %v843_v10 = vld [vmem:[#allocation6] sm:$0xff] }
 0x44e   : > { %1193 = vrcp.f32 %v845_v8 }
 0x44f   : > { %v622_v5 = vpop.permute.xlu0 %621 }
 0x450   : > { %v635_v25 = vmul.f32 %v622_v5, %v611_v23 }
 0x451   : > { %v846_v9 = vld [vmem:[#allocation6 + $0x18] sm:$0xff] }
 0x452   : > { %1195 = vrcp.f32 %v846_v9 }
 0x453   : > { %1197 = vrcp.f32 %v843_v10 }
 0x454   : > { %v1192_v11 = vpop.eup %1191 }
 0x455   : > { %v850_v12 = vmul.f32 0.35355338, %v1192_v11 }
 0x457   : > { %862 = vperm.xlu0 %1171, %v850_v12  }
 0x458   : > { %v1194_v13 = vpop.eup %1193 }
 0x459   : > { %v852_v14 = vmul.f32 0.35355338, %v1194_v13 }
 0x45b   : > { %867 = vperm.xlu1 %1172, %v852_v14  }
 0x45c   : > { %v1196_v15 = vpop.eup %1195 }
 0x45d   : > { %v854_v16 = vmul.f32 0.35355338, %v1196_v15  ;;  %v1198_v17 = vpop.eup %1197 }
 0x45e   : > { %v848_v18 = vmul.f32 0.35355338, %v1198_v17 }
 0x45f   : > { %616 = vperm.xlu1 %1172, %v1190_v54   ;;  %872 = vperm.xlu0 %1171, %v854_v16  }
 0x463   : > { %857 = vperm.xlu0 %1171, %v848_v18  }
 0x482   : > { %v683_v19 = vpop.f32.mrb[8].mxu1 }
 0x483   : > { %v1074_v20 = vpop.f32.mrb[9].mxu1 }
 0x484   : > { %v686_v21 = vpop.f32.mrb[10].mxu1 }
 0x485   : > { %v1075_v22 = vpop.f32.mrb[11].mxu1 }
 0x48d   : > { %v729_v27 = vpop.f32.mrb[12].mxu0 }
 0x48e   : > { %v828_v28 = vadd.f32 %v729_v27, %v635_v25  ;;  %v1080_v29 = vpop.f32.mrb[13].mxu0 }
 0x48f   : > { %v732_v30 = vpop.f32.mrb[14].mxu0 }
 0x490   : > { %832 = vst.msk [vmem:[#allocation7 + $0x8] sm:$0xff] %vm308_vm2, %v828_v28  ;;  %v1081_v32 = vpop.f32.mrb[15].mxu0 }
 0x491   : > { %v775_v35 = vpop.f32.mrb[12].mxu1 }
 0x492   : > { %v829_v36 = vadd.f32 %v775_v35, %v636_v31  ;;  %v1086_v37 = vpop.f32.mrb[13].mxu1 }
 0x493   : > { %v778_v38 = vpop.f32.mrb[14].mxu1 }
 0x494   : > { %833 = vst.msk [vmem:[#allocation7 + $0x10] sm:$0xff] %vm308_vm2, %v829_v36  ;;  %v1087_v40 = vpop.f32.mrb[15].mxu1 }
 0x495   : > { %v821_v41 = vpop.f32.mrb[16].mxu0 }
 0x496   : > { %v830_v42 = vadd.f32 %v821_v41, %v637_v39  ;;  %v1092_v43 = vpop.f32.mrb[17].mxu0 }
 0x497   : > { %v824_v44 = vpop.f32.mrb[18].mxu0  ;;  %v840_v47 = vld [vmem:[#allocation7 + $0x8] sm:$0xff] }
 0x498   : > { %834 = vst.msk [vmem:[#allocation7 + $0x18] sm:$0xff] %vm308_vm2, %v830_v42  ;;  %v1093_v45 = vpop.f32.mrb[19].mxu0 }
 0x49b   : > { %v841_v0 = vld [vmem:[#allocation7 + $0x10] sm:$0xff] }
 0x49f   : > { %v842_v53 = vld [vmem:[#allocation7 + $0x18] sm:$0xff] }
 0x4d6   : > { %v863_v46 = vpop.permute.xlu0 %862 }
 0x4d7   : > { %v876_v48 = vmul.f32 %v863_v46, %v840_v47 }
 0x4d9   : > { %881 = vrot.lane.b32.xlu1 %v876_v48, %s1348_s7 }
 0x4da   : > { %v868_v49 = vpop.permute.xlu1 %867 }
 0x4db   : > { %v877_v50 = vmul.f32 %v868_v49, %v841_v0 }
 0x4dd   : > { %887 = vrot.lane.b32.xlu0 %v877_v50, %s1349_s18 }
 0x4de   : > { %v873_v52 = vpop.permute.xlu0 %872  ;;  %v617_v54 = vpop.permute.xlu1 %616 }
 0x4df   : > { %v878_v55 = vmul.f32 %v873_v52, %v842_v53  ;;  %v634_v56 = vmul.f32 %v617_v54, %v610_v51 }
 0x4e1   : > { %v827_v58 = vadd.f32 %v683_v19, %v634_v56  ;;  %893 = vrot.lane.b32.xlu1 %v878_v55, %s1350_s24 }
 0x4e2   : > { %v858_v60 = vpop.permute.xlu0 %857 }
 0x4e3   : > { %831 = vst.msk [vmem:[#allocation7] sm:$0xff] %vm308_vm2, %v827_v58 }
 0x4ea   : > { %v839_v62 = vld [vmem:[#allocation7] sm:$0xff] }
 0x4eb   : > { %v875_v63 = vmul.f32 %v858_v60, %v839_v62 }
 0x4ed   : > { %879 = vst.msk [vmem:[%s173_s26] sm:$0xff] %vm308_vm2, %v875_v63 }
 0x54b   : > { %v882_v1 = vpop.permute.xlu1 %881 }
 0x54c   : > { %885 = vst.msk [vmem:[%s173_s26] sm:$0xff] %vm884_vm7, %v882_v1 }
 0x54f   : > { %v888_v2 = vpop.permute.xlu0 %887 }
 0x550   : > { %891 = vst.msk [vmem:[%s173_s26] sm:$0xff] %vm890_vm8, %v888_v2 }
 0x553   : > { %v894_v3 = vpop.permute.xlu1 %893 }
 0x554   : > { %897 = vst.msk [vmem:[%s173_s26] sm:$0xff] %vm896_vm9, %v894_v3 }
 0x555   : > { %1270 = shalt.err (!%p1267_p7)
}
 0x556   : > { %s1271_s20 = scalar_lea.hbm %s1691_s27, 128  ;;  %s1275_s5 = scalar_lea.hbm %s1737_s2, 256 }
 0x557   : > { %p1272_p9 = scmp.ne.s32.totalorder %s1691_s27, %s1271_s20  ;;  %p1276_p0 = scmp.lt.u32.totalorder %s1691_s27, %s1737_s2 }
 0x558   : > { %p1277_p1 = scmp.lt.u32.totalorder %s1275_s5, %s1271_s20  ;;  %p1279_p4 = scmp.lt.u32.totalorder %s1271_s20, %s1691_s27 }
 0x559   : > { %p1273_p2 = pnand %p1272_p9, %p1458_p12 }
 0x55a   : > { %p1278_p11 = por %p1277_p1, %p1276_p0 }
 0x55b   : > { %p1274_p5 = pneg %p1273_p2 }
 0x55c   : > { %p1280_p6 = por %p1279_p4, %p1278_p11 }
 0x55e   : > { %p1281_p8 = pnand %p1280_p6, %p1274_p5 }
 0x560   : > { %1284 = shalt.err (!%p1281_p8)
}
 0x561   : > { %1100 = dma.vmem_to_hbm [thread:$0]  (%p1458_p12), %s1693_s29, 128, %s1691_s27, %s899_s22  }
 0x562 PF: > { %s924_s18 = sand.u32 1, %s1315_s9   ;;  %p1752_p10 = scmp.ne.s32.totalorder %s1742_s16, 0 }
 0x563   : > { %p1753_p13 = scmp.ge.s32.totalorder %s1327_s12, 2  ;;  %s925_s24 = scalar_lea.sflag [#allocation10], %s924_s18 }
 0x565   : > { %p1111_p3 = pnand %p1753_p13, %p1752_p10 }
 0x567   : > { %1310 = dma.done.wait (!%p1111_p3), %s925_s24, 128  }
 0x568   : > { %1312 = vsyncadd (!%p1111_p3), %s925_s24, 4294967168  ;;  %p16_p7 = scmp.ge.s32.totalorder %s1423_s21, 4   ;;  %s1754_s9 = smov %s1319_s10 }
 0x569   : > { %s1755_s10 = smov %s1323_s11  ;;  %s1756_s11 = smov %s1454_s8 }
 0x56a   : > { %s1757_s12 = smov %s1423_s21  ;;  %18 = sbr.rel (!%p16_p7) target bundleno = 6 (0x6), region = 86 }
 0x571   :  { %930 = vsyncpa [#allocation9], 1 }
 0x572   :  { %932 = vsyncpa [#allocation9 + $0x1], 1 }
 0x573   :  { %933 = vsyncpa [#allocation12], 1 }
 0x574   :  { %934 = vsyncpa [#allocation10], 1 }
 0x575   :  { %936 = vsyncpa [#allocation10 + $0x1], 1 }

</bundles_post_ra>
